<compile_context>
chip_gen: v7x
topology: tpu7x:2x2x1
jax: 0.10.0
libtpu: 0.0.40
codegen_flags: <defaults>
</compile_context>

<pallas_src>
import jax
import jax.numpy as jnp
from jax.experimental import pallas as pl
from jax.experimental.pallas import tpu as pltpu


def _round_up(x, m):
    return (x + m - 1) // m * m


def _vmem_budget_bytes():
    """~75% of physical VMEM (48 MiB on v7x, 96 MiB on v5e/v6e), safe fallback."""
    cap = 64 * 1024 * 1024  # conservative (v7x) fallback
    try:
        cap = int(pltpu.get_tpu_info().vmem_capacity_bytes)
    except Exception:
        pass
    return min(int(cap * 3 // 4), 96 * 1024 * 1024)


def _supports_buffered():
    """pipeline_mode=pl.Buffered(k) is available on recent jax; probe safely."""
    if not hasattr(pl, "Buffered"):
        return False
    try:
        pl.BlockSpec((8, 128), lambda i, j, k: (0, 0),
                     pipeline_mode=pl.Buffered(3))
        return True
    except Exception:
        return False


# ---------------------------------------------------------------------------
# Kernels
# ---------------------------------------------------------------------------
def _linear_relu_small_kernel(x_ref, w_ref, b_ref, o_ref):
    """Whole problem in a single block: relu(x @ w + b)."""
    acc = jnp.dot(x_ref[...], w_ref[...], preferred_element_type=jnp.float32)
    acc = acc + b_ref[...].astype(jnp.float32)
    o_ref[...] = jnp.maximum(acc, 0.0).astype(o_ref.dtype)


def _linear_relu_kernel(x_ref, w_ref, b_ref, o_ref, acc_ref):
    """One (tm, tn) output tile; grid axis 2 walks the contraction (K)."""

    @pl.when(pl.program_id(2) == 0)
    def _init():
        acc_ref[...] = jnp.zeros_like(acc_ref)

    # MXU matmul with f32 accumulation in the VMEM scratch.
    acc_ref[...] += jnp.dot(
        x_ref[...], w_ref[...], preferred_element_type=jnp.float32
    )

    @pl.when(pl.program_id(2) == pl.num_programs(2) - 1)
    def _finalize():
        acc = acc_ref[...] + b_ref[...].astype(jnp.float32)  # (1, tn) broadcast
        o_ref[...] = jnp.maximum(acc, 0.0).astype(o_ref.dtype)


# ---------------------------------------------------------------------------
# Wrappers
# ---------------------------------------------------------------------------
def make_linear_relu(w, b, *, compute_dtype=jnp.bfloat16,
                     tm_cap=512, tn_cap=512, tk_cap=None):
    """Build y = relu(x @ w + b); parameters are padded/cast once (hoisted).

    w: (in_features, out_features)   (transpose of torch nn.Linear.weight)
    b: (out_features,)
    compute_dtype: MXU input dtype (None -> keep x/w dtype). Accumulation,
                   bias add and ReLU are always f32.
    Returns fn(x) with x: (batch, in_features) -> (batch, out_features).
    """
    in_f, out_f = w.shape
    assert b.shape == (out_f,)

    cdt = compute_dtype
    dsz = jnp.dtype(cdt).itemsize if cdt is not None else w.dtype.itemsize
    sub = 16 if dsz <= 2 else 8       # bf16 packs 16 sublanes per vreg
    align = 256                        # keeps the 256x256 MXU (v6e/v7x) full

    if tk_cap is None:
        tk_cap = 2048 if dsz <= 2 else 1024
    tn = min(tn_cap, _round_up(out_f, align))
    tk = min(tk_cap, _round_up(in_f, align))

    budget = _vmem_budget_bytes()

    def _footprint(tm_, tn_, tk_, wbuf):
        x_b = 2 * tm_ * tk_ * dsz          # double-buffered x tile
        w_b = wbuf * tk_ * tn_ * dsz       # wbuf-deep weight tile
        b_b = 2 * tn_ * 4                  # bias tile
        o_b = 2 * tm_ * tn_ * 4            # double-buffered out tile (f32)
        a_b = tm_ * tn_ * 4                # accumulator scratch
        return x_b + w_b + b_b + o_b + a_b

    # Shrink (rarely triggers with the caps above) so worst-case tm fits VMEM.
    while _footprint(tm_cap, tn, tk, 2) > budget and tk > 256:
        tk = max(256, tk // 2)
    while _footprint(tm_cap, tn, tk, 2) > budget and tn > 256:
        tn = max(256, tn // 2)
    while _footprint(tm_cap, tn, tk, 2) > budget and tm_cap > sub:
        tm_cap = max(sub, tm_cap // 2)

    K = _round_up(in_f, tk)
    N = _round_up(out_f, tn)
    nk = K // tk

    # 3-deep weight buffering hides DMA start latency in the small-batch,
    # memory-bound regime (esp. v7x); only when >= 3 K steps and it fits.
    w_buffers = 2
    if nk >= 3 and _supports_buffered() and _footprint(tm_cap, tn, tk, 3) <= budget:
        w_buffers = 3

    # ---- pad / cast parameters ONCE (hoisted out of the per-call hot path) --
    w_pad = w if cdt is None else w.astype(cdt)
    if w_pad.shape != (K, N):
        w_pad = jnp.pad(w_pad, ((0, K - in_f), (0, N - out_f)))
    b_pad = b.astype(jnp.float32).reshape(1, out_f)
    if N != out_f:
        b_pad = jnp.pad(b_pad, ((0, 0), (0, N - out_f)))
    w_pad = jax.block_until_ready(w_pad)
    b_pad = jax.block_until_ready(b_pad)

    # Un-padded copies for the sub-tile fast path (tiny, so cheap to keep).
    fast_ok = in_f <= 256 and out_f <= 256
    w_small = w if fast_ok else None
    b_small = b.reshape(1, out_f) if fast_ok else None

    if w_buffers == 3:
        w_spec = pl.BlockSpec((tk, tn), lambda i, j, k: (k, j),
                              pipeline_mode=pl.Buffered(3))
    else:
        w_spec = pl.BlockSpec((tk, tn), lambda i, j, k: (k, j))

    def fn(x):
        B, in_f2 = x.shape
        assert in_f2 == in_f
        out_dtype = x.dtype

        # ---- small-shape fast path: one block, no padding, no casts --------
        if fast_ok and B <= 256:
            return pl.pallas_call(
                _linear_relu_small_kernel,
                out_shape=jax.ShapeDtypeStruct((B, out_f), out_dtype),
                grid=(1,),
                in_specs=[
                    pl.BlockSpec((B, in_f), lambda i: (0, 0)),
                    pl.BlockSpec((in_f, out_f), lambda i: (0, 0)),
                    pl.BlockSpec((1, out_f), lambda i: (0, 0)),
                ],
                out_specs=pl.BlockSpec((B, out_f), lambda i: (0, 0)),
                compiler_params=pltpu.CompilerParams(
                    dimension_semantics=("arbitrary",)),
            )(x, w_small, b_small)

        # ---- tiled path -----------------------------------------------------
        # Full-M residency when it fits (tm covers the padded batch), so the
        # weight matrix is streamed from HBM exactly once per call.
        tm = min(tm_cap, _round_up(B, sub))
        M = _round_up(B, tm)

        xc = x if cdt is None else x.astype(cdt)
        if xc.shape != (M, K):
            xc = jnp.pad(xc, ((0, M - B), (0, K - in_f)))

        grid = (M // tm, N // tn, K // tk)
        out_isz = jnp.dtype(out_dtype).itemsize
        cost = pl.CostEstimate(
            flops=2 * M * N * K,
            bytes_accessed=int(dsz * (M * K + K * N) + 4 * N + out_isz * M * N),
            transcendentals=0,
        )

        out_padded = pl.pallas_call(
            _linear_relu_kernel,
            out_shape=jax.ShapeDtypeStruct((M, N), out_dtype),
            grid=grid,
            in_specs=[
                pl.BlockSpec((tm, tk), lambda i, j, k: (i, k)),
                w_spec,
                # bias block index constant over K -> DMA'd once per out tile
                pl.BlockSpec((1, tn), lambda i, j, k: (0, j)),
            ],
            out_specs=pl.BlockSpec((tm, tn), lambda i, j, k: (i, j)),
            scratch_shapes=[pltpu.VMEM((tm, tn), jnp.float32)],
            compiler_params=pltpu.CompilerParams(
                # M, N parallel (shards across v7x's 2 TCs); K is the reduction.
                dimension_semantics=("parallel", "parallel", "arbitrary"),
                vmem_limit_bytes=budget,
            ),
            cost_estimate=cost,
        )(xc, w_pad, b_pad)

        if (M, N) != (B, out_f):
            out_padded = out_padded[:B, :out_f]
        return out_padded

    return fn


def linear_relu(x, w, b, **kwargs):
    """One-shot convenience wrapper (prefer make_linear_relu for repeated calls)."""
    return make_linear_relu(w, b, **kwargs)(x)


if __name__ == "__main__":
    key = jax.random.PRNGKey(0)
    kx, kw, kb, kx2, kw2, kb2 = jax.random.split(key, 6)

    # --- Case 1: module-consistent small shapes (batch=8, in=32, out=32) ----
    # Exercises the sub-tile fast path (single full-array block, no padding).
    B, IN_F, OUT_F = 8, 32, 32
    bound = 1.0 / (IN_F ** 0.5)
    x = jax.random.normal(kx, (B, IN_F), dtype=jnp.float32)
    w = jax.random.uniform(kw, (IN_F, OUT_F), dtype=jnp.float32,
                           minval=-bound, maxval=bound)
    b = jax.random.uniform(kb, (OUT_F,), dtype=jnp.float32,
                           minval=-bound, maxval=bound)

    out = linear_relu(x, w, b)
    jax.block_until_ready(out)
    ref = jnp.maximum(
        jax.lax.dot(x, w, precision=jax.lax.Precision.HIGHEST) + b, 0.0)
    assert out.shape == (B, OUT_F)
    assert jnp.allclose(out, ref, atol=1e-4, rtol=1e-4)

    # --- Case 2: tiled path, bf16 MXU inputs (default), f32 accumulation ----
    # Small tile caps force a real (i, j, k) grid with K-accumulation and
    # (when supported) 3-deep weight buffering.
    B2, IN2, OUT2 = 200, 640, 384  # deliberately not tile multiples
    bound2 = 1.0 / (IN2 ** 0.5)
    x2 = jax.random.normal(kx2, (B2, IN2), dtype=jnp.float32)
    w2 = jax.random.uniform(kw2, (IN2, OUT2), dtype=jnp.float32,
                            minval=-bound2, maxval=bound2)
    b2 = jax.random.uniform(kb2, (OUT2,), dtype=jnp.float32,
                            minval=-bound2, maxval=bound2)
    ref2 = jnp.maximum(
        jax.lax.dot(x2, w2, precision=jax.lax.Precision.HIGHEST) + b2, 0.0)

    fn_bf16 = make_linear_relu(w2, b2, tn_cap=256, tk_cap=256)  # bf16 default
    out2 = fn_bf16(x2)
    jax.block_until_ready(out2)
    assert out2.shape == (B2, OUT2)
    assert jnp.allclose(out2, ref2, atol=5e-2, rtol=5e-2)

    # --- Case 3: tiled path, f32 MXU inputs (compute_dtype=None) ------------
    fn_f32 = make_linear_relu(w2, b2, compute_dtype=None,
                              tn_cap=256, tk_cap=256)
    out3 = fn_f32(x2)
    jax.block_until_ready(out3)
    assert out3.shape == (B2, OUT2)
    assert jnp.allclose(out3, ref2, atol=1e-3, rtol=1e-3)

    # --- Case 4: default big tiles (full-M residency, weights streamed once) -
    out4 = make_linear_relu(w2, b2)(x2)
    jax.block_until_ready(out4)
    assert out4.shape == (B2, OUT2)
    assert jnp.allclose(out4, ref2, atol=5e-2, rtol=5e-2)

    print("KERNEL_OK")
</pallas_src>

<mosaic_0001>
module attributes {stable_mosaic.version = 11 : i64} {
  func.func @_linear_relu_small_kernel(%arg0: i32, %arg1: memref<8x32xf32, #tpu.memory_space<vmem>>, %arg2: memref<32x32xf32, #tpu.memory_space<vmem>>, %arg3: memref<1x32xf32, #tpu.memory_space<vmem>>, %arg4: memref<8x32xf32, #tpu.memory_space<vmem>>) attributes {dimension_semantics = [#tpu.dimension_semantics<arbitrary>], iteration_bounds = array<i64: 1>, scalar_prefetch = 0 : i64, scratch_operands = 0 : i64, tpu.core_type = #tpu.core_type<tc>, window_params = [{pipeline_mode = #tpu.pipeline_mode<synchronous>, transform_indices = @transform_0, window_bounds = array<i64: 8, 32>}, {pipeline_mode = #tpu.pipeline_mode<synchronous>, transform_indices = @transform_1, window_bounds = array<i64: 32, 32>}, {pipeline_mode = #tpu.pipeline_mode<synchronous>, transform_indices = @transform_2, window_bounds = array<i64: 1, 32>}, {pipeline_mode = #tpu.pipeline_mode<synchronous>, transform_indices = @transform_3, window_bounds = array<i64: 8, 32>}]} {
    %c0 = arith.constant 0 : index
    %c0_0 = arith.constant 0 : index
    %0 = vector.load %arg1[%c0, %c0_0] : memref<8x32xf32, #tpu.memory_space<vmem>>, vector<8x32xf32>
    %c0_1 = arith.constant 0 : index
    %c0_2 = arith.constant 0 : index
    %1 = vector.load %arg2[%c0_1, %c0_2] : memref<32x32xf32, #tpu.memory_space<vmem>>, vector<32x32xf32>
    %cst = arith.constant dense<0.000000e+00> : vector<8x32xf32>
    %2 = tpu.matmul %0, %1, %cst {dimension_numbers = #tpu.dot_dimension_numbers<[1], [0], [0], [1], [0, 0, 1, 1], [], []>} : vector<8x32xf32>, vector<32x32xf32>, vector<8x32xf32> -> vector<8x32xf32>
    %c0_3 = arith.constant 0 : index
    %c0_4 = arith.constant 0 : index
    %3 = vector.load %arg3[%c0_3, %c0_4] : memref<1x32xf32, #tpu.memory_space<vmem>>, vector<1x32xf32>
    %4 = vector.broadcast %3 : vector<1x32xf32> to vector<8x32xf32>
    %5 = arith.addf %2, %4 : vector<8x32xf32>
    %cst_5 = arith.constant 0.000000e+00 : f32
    %6 = vector.broadcast %cst_5 : f32 to vector<8x32xf32>
    %7 = arith.maximumf %5, %6 : vector<8x32xf32>
    %c0_6 = arith.constant 0 : index
    %c0_7 = arith.constant 0 : index
    %8 = vector.load %arg4[%c0_6, %c0_7] : memref<8x32xf32, #tpu.memory_space<vmem>>, vector<8x32xf32>
    tpu.vector_store %arg4[%c0_6, %c0_7], %7 {strides = array<i32>} : memref<8x32xf32, #tpu.memory_space<vmem>>, vector<8x32xf32>,
    return
  }
  func.func @transform_0(%arg0: i32) -> (i32, i32) {
    %c0_i32 = arith.constant 0 : i32
    %c0_i32_0 = arith.constant 0 : i32
    %c0_i32_1 = arith.constant 0 : i32
    return %c0_i32, %c0_i32_0 : i32, i32
  }
  func.func @transform_1(%arg0: i32) -> (i32, i32) {
    %c0_i32 = arith.constant 0 : i32
    %c0_i32_0 = arith.constant 0 : i32
    %c0_i32_1 = arith.constant 0 : i32
    return %c0_i32, %c0_i32_0 : i32, i32
  }
  func.func @transform_2(%arg0: i32) -> (i32, i32) {
    %c0_i32 = arith.constant 0 : i32
    %c0_i32_0 = arith.constant 0 : i32
    %c0_i32_1 = arith.constant 0 : i32
    return %c0_i32, %c0_i32_0 : i32, i32
  }
  func.func @transform_3(%arg0: i32) -> (i32, i32) {
    %c0_i32 = arith.constant 0 : i32
    %c0_i32_0 = arith.constant 0 : i32
    %c0_i32_1 = arith.constant 0 : i32
    return %c0_i32, %c0_i32_0 : i32, i32
  }
}

</mosaic_0001>

<bundles_post_ra>
// kernel: tpu_custom_call.1
= control target key start
LH: loop header
LB: loop body
LE: loop exit
PB: predicated region body
PF: predicated region fallthrough
CT: control target
= control target key end

     0   :  { %8 = vsyncpa [#allocation3], 0  ;;  %s323_s0 = inlined_call_operand.hbm [shape: f32[8,32], index: 0, kind: input, shape index: {}]   ;;  %s324_s1 = inlined_call_operand.hbm [shape: f32[32,32], index: 1, kind: input, shape index: {}]   ;;  %s325_s2 = inlined_call_operand.vmem [shape: f32[1,32], index: 2, kind: input, shape index: {}]   ;;  %s326_s3 = inlined_call_operand.hbm [shape: f32[8,32], index: 3, kind: output, shape index: {}]  }
   0x1   :  { %9 = vsyncpa [#allocation6], 0 }
   0x2   :  { %10 = vsyncpa [#allocation4], 0  ;;  %s249_s12 = smov [#allocation2]   ;;  %s250_s14 = smov [#allocation5]  }
   0x3   :  { %s17_s13 = sshll.u32 %s249_s12, 4  ;;  %s26_s15 = sshll.u32 %s250_s14, 4  ;;  %s18_s13 = int_to_ptr.vmem [resolvable:$true] %s17_s13  ;;  %s277_s15 = int_to_ptr.vmem [resolvable:$true] %s26_s15 }
   0x4   :  { %s177_s18 = scalar_lea.hbm %s323_s0, 128 }
   0x5   :  { %p178_p0 = scmp.ne.s32.totalorder %s323_s0, %s177_s18  ;;  %p181_p1 = scmp.lt.u32.totalorder %s177_s18, %s323_s0 }
   0x7   :  { %p183_p2 = pnand %p181_p1, %p178_p0 }
   0x9   :  { %186 = shalt.err (!%p183_p2)
}
   0xa   :  { %s187_s23 = scalar_lea.vmem %s18_s13, 128  ;;  %p192_p4 = scmp.lt.s32.totalorder %s18_s13, %s18_s13 }
   0xb   :  { %p188_p3 = scmp.ne.s32.totalorder %s18_s13, %s187_s23  ;;  %p193_p5 = scmp.lt.s32.totalorder %s187_s23, %s187_s23 }
   0xd   :  { %p194_p6 = por %p193_p5, %p192_p4 }
   0xf   :  { %p195_p7 = pnand %p194_p6, %p188_p3 }
  0x11   :  { %198 = shalt.err (!%p195_p7)
}
  0x12   :  { %20 = dma.hbm_to_vmem [thread:$0]  %s323_s0, 128, %s18_s13, [#allocation3]  }
  0x13   :  { %s199_s28 = scalar_lea.hbm %s324_s1, 512 }
  0x14   :  { %p200_p8 = scmp.ne.s32.totalorder %s324_s1, %s199_s28  ;;  %p203_p9 = scmp.lt.u32.totalorder %s199_s28, %s324_s1 }
  0x16   :  { %p205_p10 = pnand %p203_p9, %p200_p8 }
  0x18   :  { %208 = shalt.err (!%p205_p10)
}
  0x19   :  { %s209_s6 = scalar_lea.vmem %s277_s15, 512  ;;  %p214_p12 = scmp.lt.s32.totalorder %s277_s15, %s277_s15 }
  0x1a   :  { %p210_p11 = scmp.ne.s32.totalorder %s277_s15, %s209_s6  ;;  %p215_p13 = scmp.lt.s32.totalorder %s209_s6, %s209_s6 }
  0x1c   :  { %p216_p0 = por %p215_p13, %p214_p12 }
  0x1e   :  { %p217_p1 = pnand %p216_p0, %p210_p11 }
  0x20   :  { %220 = shalt.err (!%p217_p1)
}
  0x21   :  { %s251_s0 = smov 128   ;;  %s252_s7 = smov 8  }
  0x22   :  { %32 = dma.hbm_to_vmem [thread:$0]  %s324_s1, 512, %s277_s15, [#allocation6], %s251_s0, %s251_s0, %s252_s7  }
  0x23   :  { %243 = dma.done.wait [#allocation3], 128  }
  0x24   :  { %244 = vsyncadd [#allocation3], 4294967168 }
  0x25   :  { %245 = dma.done.wait [#allocation6], 512  }
  0x26   :  { %246 = vsyncadd [#allocation6], 4294966784  ;;  %v253_v0 = vmov 0.0|0.0   ;;  %vm254_vm0 = vmmov 0   ;;  %v255_v1 = vmov 0.0   ;;  %v42_v2 = vld [vmem:[#allocation5] sm:$0xff] }
  0x27   :  { %163 = vmatprep.subr.bf16.mxu0 %v253_v0  ;;  %160 = vmatprep.mubr.msk.f32.mxu0 %vm254_vm0, %v255_v1  ;;  %v43_v3 = vld [vmem:[#allocation5 + $0x8] sm:$0xff]  ;;  %v44_v4 = vld [vmem:[#allocation5 + $0x10] sm:$0xff]  ;;  %v45_v6 = vld [vmem:[#allocation5 + $0x18] sm:$0xff]  ;;  %vm53_vm1 = vcmask 261120   ;;  %s256_s11 = smov [#allocation7]  }
  0x28   :  { %v164_v5 = vpack.c.bf16 %v43_v3, %v42_v2  ;;  %v167_v7 = vpack.c.bf16 %v45_v6, %v44_v4  ;;  %v41_v8 = vld [vmem:[#allocation2] sm:$0xff]  ;;  %s135_s12 = sshll.u32 %s256_s11, 4  ;;  %s136_s12 = int_to_ptr.vmem [resolvable:$true] %s135_s12 }
  0x29   :  { %v145_v9 = vld [vmem:[%s325_s2] ss:$0 sm:$0xff]  ;;  %s221_s13 = scalar_lea.vmem %s136_s12, 128  ;;  %p226_p3 = scmp.lt.s32.totalorder %s136_s12, %s136_s12 }
  0x2a   :  { %165 = vmatpush3.bf16.msra.mxu0 %v164_v5  ;;  %p222_p2 = scmp.ne.s32.totalorder %s136_s12, %s221_s13  ;;  %p227_p4 = scmp.lt.s32.totalorder %s221_s13, %s221_s13 }
  0x2b   :  { %166 = vmatprep.subr.bf16.mxu0 %v253_v0 }
  0x2c   :  { %p228_p5 = por %p227_p4, %p226_p3 }
  0x2e   :  { %168 = vmatpush3.bf16.msra.mxu0 %v167_v7  ;;  %p229_p6 = pnand %p228_p5, %p222_p2 }
  0x31   :  { %161 = vmatmul.mubr.msk.f32.vlgmr.msra.gmra.mrb[0].mxu0 %vm53_vm1, %v41_v8 }
 0x104   :  { %v123_v10 = vpop.f32.mrb[0].mxu0 }
 0x105   :  { %v124_v11 = vadd.f32 %v145_v9, %v123_v10  ;;  %v162_v12 = vpop.f32.mrb[1].mxu0 }
 0x107   :  { %v127_v13 = vmax.f32 %v124_v11, 0.0 }
 0x109   :  { %128 = vst.msk [vmem:[#allocation7] sm:$0xff] %vm53_vm1, %v127_v13 }
 0x10a   :  { %232 = shalt.err (!%p229_p6)
}
 0x10b   :  { %s233_s16 = scalar_lea.hbm %s326_s3, 128 }
 0x10c   :  { %p234_p7 = scmp.ne.s32.totalorder %s326_s3, %s233_s16  ;;  %p237_p8 = scmp.lt.u32.totalorder %s233_s16, %s326_s3 }
 0x10e   :  { %p239_p9 = pnand %p237_p8, %p234_p7 }
 0x110   :  { %242 = shalt.err (!%p239_p9)
}
 0x111   :  { %138 = dma.vmem_to_hbm [thread:$0]  %s136_s12, 128, %s326_s3, [#allocation4]  }
 0x112   :  { %247 = dma.done.wait [#allocation4], 128  }
 0x113   :  { %248 = vsyncadd [#allocation4], 4294967168 }
 0x114   :  { %142 = vsyncpa [#allocation3], 1 }
 0x115   :  { %143 = vsyncpa [#allocation6], 1 }
 0x116   :  { %144 = vsyncpa [#allocation4], 1 }

</bundles_post_ra>
